<compile_context>
chip_gen: v5e
topology: v5e:2x2
jax: 0.10.0
libtpu: 0.0.40
codegen_flags: <defaults>
</compile_context>

<pallas_src>
import jax
import jax.numpy as jnp
import numpy as np
from jax.experimental import pallas as pl
from jax.experimental.pallas import tpu as pltpu


# ----------------------------- Pallas kernel ------------------------------ #
def decoder_step_kernel(
    tok_ref,        # SMEM (B,)      int32 token ids
    emb_ref,        # VMEM (V, 1, E) embedding table
    h_ref,          # VMEM (B, H)
    c_ref,          # VMEM (B, H)
    wih_ref,        # VMEM (E, 4H)   stacked input->gate weights (i,f,g,o columns)
    whh_ref,        # VMEM (H, 4H)   stacked hidden->gate weights
    b_ref,          # VMEM (1, 4H)   merged bias (b_ih + b_hh)
    wfc_ref,        # VMEM (H, Vp)   FC weight, V padded to multiple of 128
    bfc_ref,        # VMEM (1, Vp)
    pred_ref,       # VMEM (B, Vp)
    h_out_ref,      # VMEM (B, H)
    c_out_ref,      # VMEM (B, H)
):
    B, H = h_ref.shape

    # In-kernel embedding gather: B is small & static -> unrolled dynamic row loads
    # along the leading (untiled) dim of the (V, 1, E) table.
    emb = jnp.concatenate([emb_ref[tok_ref[b]] for b in range(B)], axis=0)  # (B, E)

    h = h_ref[...]
    c = c_ref[...]

    # Single fused gate pre-activation: (B, 4H); gate order i,f,g,o along lanes
    # (matches PyTorch's W_ih/W_hh row-block layout, preserved by the transpose).
    gates = (
        jnp.dot(emb, wih_ref[...], preferred_element_type=jnp.float32)
        + jnp.dot(h, whh_ref[...], preferred_element_type=jnp.float32)
        + b_ref[...]
    )

    i_g = jax.nn.sigmoid(gates[:, 0 * H:1 * H])
    f_g = jax.nn.sigmoid(gates[:, 1 * H:2 * H])
    g_g = jnp.tanh(gates[:, 2 * H:3 * H])
    o_g = jax.nn.sigmoid(gates[:, 3 * H:4 * H])

    c_new = f_g * c + i_g * g_g
    h_new = o_g * jnp.tanh(c_new)

    # Lane-dense FC projection (Vp is a multiple of 128 -> unmasked stores).
    pred_ref[...] = (
        jnp.dot(h_new, wfc_ref[...], preferred_element_type=jnp.float32)
        + bfc_ref[...]
    )
    h_out_ref[...] = h_new
    c_out_ref[...] = c_new


# ----------------------- one-time parameter layout prep -------------------- #
def prepare_decoder_params(params):
    """Hoists all layout work (slices/transposes/bias merge/padding) out of the
    per-step forward. Call once; reuse the result for every decode step."""
    emb_table = jnp.asarray(params["embedding"], jnp.float32)   # (V, E)
    w_ih = jnp.asarray(params["w_ih"], jnp.float32)             # (4H, E)
    w_hh = jnp.asarray(params["w_hh"], jnp.float32)             # (4H, H)
    b_ih = jnp.asarray(params["b_ih"], jnp.float32)             # (4H,)
    b_hh = jnp.asarray(params["b_hh"], jnp.float32)             # (4H,)
    w_fc = jnp.asarray(params["w_fc"], jnp.float32)             # (V, H)
    b_fc = jnp.asarray(params["b_fc"], jnp.float32)             # (V,)

    V, E = emb_table.shape
    H = w_hh.shape[1]
    Vp = ((V + 127) // 128) * 128   # lane-dense padded vocab

    return {
        "emb_table": emb_table.reshape(V, 1, E),                # leading-dim gather
        "w_ih_t": w_ih.T,                                       # (E, 4H)
        "w_hh_t": w_hh.T,                                       # (H, 4H)
        "b_lstm": (b_ih + b_hh).reshape(1, 4 * H),              # (1, 4H)
        "w_fc_t": jnp.pad(w_fc.T, ((0, 0), (0, Vp - V))),       # (H, Vp)
        "b_fc": jnp.pad(b_fc, (0, Vp - V)).reshape(1, Vp),      # (1, Vp)
    }


# ------------------------------- forward step ------------------------------ #
@jax.jit
def decoder_forward(input_tok, hidden, prepped):
    """Mirrors Decoder.forward(input_tok, hidden) for a 1-layer LSTM.

    input_tok: (B,) int32 token ids
    hidden:    (h0, c0), each (1, B, H)   [PyTorch LSTM hidden layout]
    returns:   (pred (B, V), (h1, c1) each (1, B, H))
    """
    emb_table = prepped["emb_table"]               # (V, 1, E)
    V = emb_table.shape[0]
    H = prepped["w_hh_t"].shape[0]
    Vp = prepped["w_fc_t"].shape[1]
    B = input_tok.shape[0]

    h0 = hidden[0][0]                              # (B, H)
    c0 = hidden[1][0]                              # (B, H)

    vmem = pl.BlockSpec(memory_space=pltpu.MemorySpace.VMEM)
    smem = pl.BlockSpec(memory_space=pltpu.MemorySpace.SMEM)

    pred_pad, h1, c1 = pl.pallas_call(
        decoder_step_kernel,
        out_shape=(
            jax.ShapeDtypeStruct((B, Vp), jnp.float32),
            jax.ShapeDtypeStruct((B, H), jnp.float32),
            jax.ShapeDtypeStruct((B, H), jnp.float32),
        ),
        in_specs=[smem, vmem, vmem, vmem, vmem, vmem, vmem, vmem, vmem],
        out_specs=(vmem, vmem, vmem),
        # Recurrent state updated in place: h0 -> h1 (out 1), c0 -> c1 (out 2).
        input_output_aliases={2: 1, 3: 2},
    )(
        input_tok.astype(jnp.int32),
        emb_table,
        h0, c0,
        prepped["w_ih_t"], prepped["w_hh_t"], prepped["b_lstm"],
        prepped["w_fc_t"], prepped["b_fc"],
    )

    pred = pred_pad[:, :V]
    return pred, (h1[None, :, :], c1[None, :, :])


# ---------------------------- pure-JAX reference --------------------------- #
def decoder_forward_ref(input_tok, hidden, params):
    emb = params["embedding"][input_tok]
    h0, c0 = hidden[0][0], hidden[1][0]
    gates = (emb @ params["w_ih"].T + params["b_ih"]
             + h0 @ params["w_hh"].T + params["b_hh"])
    H = h0.shape[-1]
    i = jax.nn.sigmoid(gates[:, 0:H])
    f = jax.nn.sigmoid(gates[:, H:2 * H])
    g = jnp.tanh(gates[:, 2 * H:3 * H])
    o = jax.nn.sigmoid(gates[:, 3 * H:4 * H])
    c1 = f * c0 + i * g
    h1 = o * jnp.tanh(c1)
    pred = h1 @ params["w_fc"].T + params["b_fc"]
    return pred, (h1[None], c1[None])


# --------------------------------- main ------------------------------------ #
if __name__ == "__main__":
    VOCAB, EMB, HID = 32, 16, 32
    B = 2

    key = jax.random.PRNGKey(0)
    ks = jax.random.split(key, 8)
    scale = 0.1
    params = {
        "embedding": jax.random.normal(ks[0], (VOCAB, EMB), jnp.float32) * scale,
        "w_ih": jax.random.normal(ks[1], (4 * HID, EMB), jnp.float32) * scale,
        "w_hh": jax.random.normal(ks[2], (4 * HID, HID), jnp.float32) * scale,
        "b_ih": jax.random.normal(ks[3], (4 * HID,), jnp.float32) * scale,
        "b_hh": jax.random.normal(ks[4], (4 * HID,), jnp.float32) * scale,
        "w_fc": jax.random.normal(ks[5], (VOCAB, HID), jnp.float32) * scale,
        "b_fc": jax.random.normal(ks[6], (VOCAB,), jnp.float32) * scale,
    }

    input_tok = jax.random.randint(ks[7], (B,), 0, VOCAB, dtype=jnp.int32)
    h0 = jax.random.normal(jax.random.PRNGKey(1), (1, B, HID), jnp.float32) * scale
    c0 = jax.random.normal(jax.random.PRNGKey(2), (1, B, HID), jnp.float32) * scale
    hidden = (h0, c0)

    # One-time layout prep (hoisted out of the decode step).
    prepped = prepare_decoder_params(params)

    pred, (h1, c1) = decoder_forward(input_tok, hidden, prepped)
    jax.block_until_ready((pred, h1, c1))

    pred_ref, (h1_ref, c1_ref) = decoder_forward_ref(input_tok, hidden, params)
    np.testing.assert_allclose(np.asarray(pred), np.asarray(pred_ref), atol=1e-5, rtol=1e-5)
    np.testing.assert_allclose(np.asarray(h1), np.asarray(h1_ref), atol=1e-5, rtol=1e-5)
    np.testing.assert_allclose(np.asarray(c1), np.asarray(c1_ref), atol=1e-5, rtol=1e-5)

    print("KERNEL_OK")
</pallas_src>

<mosaic_0001>
module attributes {stable_mosaic.version = 11 : i64} {
  func.func @decoder_step_kernel(%arg0: memref<2xi32, #tpu.memory_space<smem>>, %arg1: memref<32x1x16xf32, #tpu.memory_space<vmem>>, %arg2: memref<2x32xf32, #tpu.memory_space<vmem>>, %arg3: memref<2x32xf32, #tpu.memory_space<vmem>>, %arg4: memref<16x128xf32, #tpu.memory_space<vmem>>, %arg5: memref<32x128xf32, #tpu.memory_space<vmem>>, %arg6: memref<1x128xf32, #tpu.memory_space<vmem>>, %arg7: memref<32x128xf32, #tpu.memory_space<vmem>>, %arg8: memref<1x128xf32, #tpu.memory_space<vmem>>, %arg9: memref<2x128xf32, #tpu.memory_space<vmem>>, %arg10: memref<2x32xf32, #tpu.memory_space<vmem>>, %arg11: memref<2x32xf32, #tpu.memory_space<vmem>>) attributes {dimension_semantics = [], scalar_prefetch = 0 : i64, scratch_operands = 0 : i64, tpu.core_type = #tpu.core_type<tc>} {
    %c0 = arith.constant 0 : index
    %0 = memref.load %arg0[%c0] : memref<2xi32, #tpu.memory_space<smem>>
    %1 = arith.index_cast %0 : i32 to index
    %c0_0 = arith.constant 0 : index
    %c0_1 = arith.constant 0 : index
    %2 = vector.load %arg1[%1, %c0_0, %c0_1] : memref<32x1x16xf32, #tpu.memory_space<vmem>>, vector<1x1x16xf32>
    %3 = vector.shape_cast %2 : vector<1x1x16xf32> to vector<1x16xf32>
    %c1 = arith.constant 1 : index
    %4 = memref.load %arg0[%c1] : memref<2xi32, #tpu.memory_space<smem>>
    %5 = arith.index_cast %4 : i32 to index
    %c0_2 = arith.constant 0 : index
    %c0_3 = arith.constant 0 : index
    %6 = vector.load %arg1[%5, %c0_2, %c0_3] : memref<32x1x16xf32, #tpu.memory_space<vmem>>, vector<1x1x16xf32>
    %7 = vector.shape_cast %6 : vector<1x1x16xf32> to vector<1x16xf32>
    %8 = tpu.concatenate %3, %7 in 0 : vector<1x16xf32>, vector<1x16xf32> -> vector<2x16xf32>
    %c0_4 = arith.constant 0 : index
    %c0_5 = arith.constant 0 : index
    %9 = vector.load %arg2[%c0_4, %c0_5] : memref<2x32xf32, #tpu.memory_space<vmem>>, vector<2x32xf32>
    %c0_6 = arith.constant 0 : index
    %c0_7 = arith.constant 0 : index
    %10 = vector.load %arg3[%c0_6, %c0_7] : memref<2x32xf32, #tpu.memory_space<vmem>>, vector<2x32xf32>
    %c0_8 = arith.constant 0 : index
    %c0_9 = arith.constant 0 : index
    %11 = vector.load %arg4[%c0_8, %c0_9] : memref<16x128xf32, #tpu.memory_space<vmem>>, vector<16x128xf32>
    %cst = arith.constant dense<0.000000e+00> : vector<2x128xf32>
    %12 = tpu.matmul %8, %11, %cst {dimension_numbers = #tpu.dot_dimension_numbers<[1], [0], [0], [1], [0, 0, 1, 1], [], []>} : vector<2x16xf32>, vector<16x128xf32>, vector<2x128xf32> -> vector<2x128xf32>
    %c0_10 = arith.constant 0 : index
    %c0_11 = arith.constant 0 : index
    %13 = vector.load %arg5[%c0_10, %c0_11] : memref<32x128xf32, #tpu.memory_space<vmem>>, vector<32x128xf32>
    %cst_12 = arith.constant dense<0.000000e+00> : vector<2x128xf32>
    %14 = tpu.matmul %9, %13, %cst_12 {dimension_numbers = #tpu.dot_dimension_numbers<[1], [0], [0], [1], [0, 0, 1, 1], [], []>} : vector<2x32xf32>, vector<32x128xf32>, vector<2x128xf32> -> vector<2x128xf32>
    %15 = arith.addf %12, %14 : vector<2x128xf32>
    %c0_13 = arith.constant 0 : index
    %c0_14 = arith.constant 0 : index
    %16 = vector.load %arg6[%c0_13, %c0_14] : memref<1x128xf32, #tpu.memory_space<vmem>>, vector<1x128xf32>
    %17 = vector.broadcast %16 : vector<1x128xf32> to vector<2x128xf32>
    %18 = arith.addf %15, %17 : vector<2x128xf32>
    %19 = vector.extract_strided_slice %18 {offsets = [0, 0], sizes = [2, 32], strides = [1, 1]} : vector<2x128xf32> to vector<2x32xf32>
    %20 = arith.negf %19 : vector<2x32xf32>
    %21 = math.exp %20 : vector<2x32xf32>
    %cst_15 = arith.constant 1.000000e+00 : f32
    %22 = vector.broadcast %cst_15 : f32 to vector<2x32xf32>
    %23 = arith.addf %22, %21 : vector<2x32xf32>
    %24 = arith.divf %22, %23 : vector<2x32xf32>
    %25 = vector.extract_strided_slice %18 {offsets = [0, 32], sizes = [2, 32], strides = [1, 1]} : vector<2x128xf32> to vector<2x32xf32>
    %26 = arith.negf %25 : vector<2x32xf32>
    %27 = math.exp %26 : vector<2x32xf32>
    %cst_16 = arith.constant 1.000000e+00 : f32
    %28 = vector.broadcast %cst_16 : f32 to vector<2x32xf32>
    %29 = arith.addf %28, %27 : vector<2x32xf32>
    %30 = arith.divf %28, %29 : vector<2x32xf32>
    %31 = vector.extract_strided_slice %18 {offsets = [0, 64], sizes = [2, 32], strides = [1, 1]} : vector<2x128xf32> to vector<2x32xf32>
    %32 = math.tanh %31 : vector<2x32xf32>
    %33 = vector.extract_strided_slice %18 {offsets = [0, 96], sizes = [2, 32], strides = [1, 1]} : vector<2x128xf32> to vector<2x32xf32>
    %34 = arith.negf %33 : vector<2x32xf32>
    %35 = math.exp %34 : vector<2x32xf32>
    %cst_17 = arith.constant 1.000000e+00 : f32
    %36 = vector.broadcast %cst_17 : f32 to vector<2x32xf32>
    %37 = arith.addf %36, %35 : vector<2x32xf32>
    %38 = arith.divf %36, %37 : vector<2x32xf32>
    %39 = arith.mulf %30, %10 : vector<2x32xf32>
    %40 = arith.mulf %24, %32 : vector<2x32xf32>
    %41 = arith.addf %39, %40 : vector<2x32xf32>
    %42 = math.tanh %41 : vector<2x32xf32>
    %43 = arith.mulf %38, %42 : vector<2x32xf32>
    %c0_18 = arith.constant 0 : index
    %c0_19 = arith.constant 0 : index
    %44 = vector.load %arg7[%c0_18, %c0_19] : memref<32x128xf32, #tpu.memory_space<vmem>>, vector<32x128xf32>
    %cst_20 = arith.constant dense<0.000000e+00> : vector<2x128xf32>
    %45 = tpu.matmul %43, %44, %cst_20 {dimension_numbers = #tpu.dot_dimension_numbers<[1], [0], [0], [1], [0, 0, 1, 1], [], []>} : vector<2x32xf32>, vector<32x128xf32>, vector<2x128xf32> -> vector<2x128xf32>
    %c0_21 = arith.constant 0 : index
    %c0_22 = arith.constant 0 : index
    %46 = vector.load %arg8[%c0_21, %c0_22] : memref<1x128xf32, #tpu.memory_space<vmem>>, vector<1x128xf32>
    %47 = vector.broadcast %46 : vector<1x128xf32> to vector<2x128xf32>
    %48 = arith.addf %45, %47 : vector<2x128xf32>
    %c0_23 = arith.constant 0 : index
    %c0_24 = arith.constant 0 : index
    %49 = vector.load %arg9[%c0_23, %c0_24] : memref<2x128xf32, #tpu.memory_space<vmem>>, vector<2x128xf32>
    tpu.vector_store %arg9[%c0_23, %c0_24], %48 {strides = array<i32>} : memref<2x128xf32, #tpu.memory_space<vmem>>, vector<2x128xf32>,
    %c0_25 = arith.constant 0 : index
    %c0_26 = arith.constant 0 : index
    %50 = vector.load %arg10[%c0_25, %c0_26] : memref<2x32xf32, #tpu.memory_space<vmem>>, vector<2x32xf32>
    tpu.vector_store %arg10[%c0_25, %c0_26], %43 {strides = array<i32>} : memref<2x32xf32, #tpu.memory_space<vmem>>, vector<2x32xf32>,
    %c0_27 = arith.constant 0 : index
    %c0_28 = arith.constant 0 : index
    %51 = vector.load %arg11[%c0_27, %c0_28] : memref<2x32xf32, #tpu.memory_space<vmem>>, vector<2x32xf32>
    tpu.vector_store %arg11[%c0_27, %c0_28], %41 {strides = array<i32>} : memref<2x32xf32, #tpu.memory_space<vmem>>, vector<2x32xf32>,
    return
  }
}

</mosaic_0001>

<bundles_post_ra>
// kernel: decoder_forward.1
= control target key start
LH: loop header
LB: loop body
LE: loop exit
PB: predicated region body
PF: predicated region fallthrough
CT: control target
= control target key end

     0   :  { %17 = vsyncpa [#allocation5], 0  ;;  %s464_s0 = inlined_call_operand.vmem [shape: s32[2], index: 0, kind: input, shape index: {}]   ;;  %s465_s1 = inlined_call_operand.vmem [shape: f32[32,1,16], index: 1, kind: input, shape index: {}]   ;;  %s466_s2 = inlined_call_operand.vmem [shape: f32[2,32], index: 2, kind: input, shape index: {}, may-alias: {2,10}]   ;;  %s467_s3 = inlined_call_operand.vmem [shape: f32[2,32], index: 3, kind: input, shape index: {}, may-alias: {3,11}]   ;;  %s468_s4 = inlined_call_operand.vmem [shape: f32[16,128], index: 4, kind: input, shape index: {}]   ;;  %s469_s5 = inlined_call_operand.vmem [shape: f32[32,128], index: 5, kind: input, shape index: {}]   ;;  %s470_s6 = inlined_call_operand.vmem [shape: f32[1,128], index: 6, kind: input, shape index: {}]   ;;  %s471_s7 = inlined_call_operand.hbm [shape: f32[32,128], index: 7, kind: input, shape index: {}]   ;;  %s472_s8 = inlined_call_operand.vmem [shape: f32[1,128], index: 8, kind: input, shape index: {}]   ;;  %s473_s9 = inlined_call_operand.hbm [shape: f32[2,128], index: 9, kind: output, shape index: {0}]   ;;  %s474_s10 = inlined_call_operand.vmem [shape: f32[2,32], index: 10, kind: output, shape index: {1}, may-alias: {2,10}]   ;;  %s475_s11 = inlined_call_operand.vmem [shape: f32[2,32], index: 11, kind: output, shape index: {2}, may-alias: {3,11}]  }
   0x1   :  { %18 = vsyncpa [#allocation3], 0 }
   0x2   :  { %19 = vsyncpa [#allocation4], 0  ;;  %s25_s19 = sshll.u32 %s464_s0, 4  ;;  %s45_s22 = sshll.u32 %s471_s7, 4  ;;  %s26_s19 = int_to_ptr.vmem [resolvable:$true] %s25_s19  ;;  %s46_s22 = int_to_ptr.hbm [resolvable:$true] %s45_s22 }
   0x3   :  { %s338_s23 = smov [#allocation2]   ;;  %s339_s24 = smov [#allocation6]  }
   0x4   :  { %28 = dma.vmem_to_smem %s26_s19, 16, %s338_s23, [#allocation5]  }
   0x5   :  { %s47_s25 = sshll.u32 %s339_s24, 4  ;;  %s340_s26 = smov 128   ;;  %s48_s25 = int_to_ptr.vmem [resolvable:$true] %s47_s25 }
   0x6   :  { %s341_s27 = smov 8  }
   0x7   :  { %53 = dma.hbm_to_vmem [thread:$0]  %s46_s22, 512, %s48_s25, [#allocation3], %s340_s26, %s340_s26, %s341_s27  }
   0x8   :  { %332 = dma.done.wait [#allocation5], 16  }
   0x9   :  { %333 = vsyncadd [#allocation5], 4294967280 }
   0xa   :  { %334 = dma.done.wait [#allocation3], 512  }
   0xb   :  { %335 = vsyncadd [#allocation3], 4294966784 }
   0xc   :  { %64 = sfence }
   0xd   :  { %v83_v0 = vld [vmem:[%s469_s5 + $0x18] sm:$0xff]  ;;  %v82_v1 = vld [vmem:[%s469_s5 + $0x10] sm:$0xff]  ;;  %s65_s30 = sld [smem:[#allocation2]]  ;;  %v79_v2 = vld [vmem:[%s468_s4 + $0x8] sm:$0xff]  ;;  %vm84_vm0 = vcmask 261120   ;;  %vm74_vm1 = vcmask 1040384  }
   0xe   :  { %100 = vmatpush.msra.mxu0 %v83_v0  ;;  %v78_v3 = vld [vmem:[%s468_s4] sm:$0xff]  ;;  %s248_s16 = sld [smem:[#allocation2 + $0x1]]  ;;  %v81_v4 = vld [vmem:[%s469_s5 + $0x8] sm:$0xff]  ;;  %126 = vmatpush.msra.mxu1 %v79_v2  ;;  %vm108_vm2 = vcmask 130048   ;;  %s342_s0 = smov 64   ;;  %v181_v37 = vld [vmem:[#allocation6 + $0x18] sm:$0xff] }
   0xf   :  { %v80_v5 = vld [vmem:[%s469_s5] sm:$0xff]  ;;  %s343_s29 = smov 32   ;;  %v180_v38 = vld [vmem:[#allocation6 + $0x10] sm:$0xff]  ;;  %203 = vmatpush.msra.mxu2 %v181_v37  ;;  %v179_v39 = vld [vmem:[#allocation6 + $0x8] sm:$0xff]  ;;  %vm213_vm7 = vcmask 254976   ;;  %s345_s15 = smov [#allocation7]  }
  0x10   :  { %101 = vmatpush.msra.mxu0 %v82_v1  ;;  %127 = vmatpush.msra.mxu1 %v78_v3  ;;  %v76_v6 = vld [vmem:[%s466_s2] sm:$0x3]  ;;  %s227_s19 = sshll.u32 %s473_s9, 4  ;;  %s228_s19 = int_to_ptr.hbm [resolvable:$true] %s227_s19 }
  0x11   :  { %v262_v11 = vld [vmem:[%s470_s6] ss:$0 sm:$0xff]  ;;  %204 = vmatpush.msra.mxu2 %v180_v38 }
  0x12   :  { %102 = vmatpush.msra.mxu0 %v81_v4  ;;  %v77_v16 = vld [vmem:[%s467_s3] sm:$0x3]  ;;  %s344_s3 = smov 96  }
  0x13   :  { %s66_s24 = scalar_lea.vmem %s465_s1, %s65_s30  ;;  %v178_v40 = vld [vmem:[#allocation6] sm:$0xff]  ;;  %205 = vmatpush.msra.mxu2 %v179_v39 }
  0x14   :  { %103 = vmatpush.msra.mxu0 %v80_v5  ;;  %v67_v7 = vld [vmem:[%s66_s24] sm:$0x1]  ;;  %s69_s27 = scalar_lea.vmem %s465_s1, %s248_s16  ;;  %s225_s16 = sshll.u32 %s345_s15, 4  ;;  %s226_s16 = int_to_ptr.vmem [resolvable:$true] %s225_s16 }
  0x15   :  { %249 = vmatmul.msk.f32.vlgmr.msra.gmra.mxu0 %vm84_vm0, %v76_v6  ;;  %v261_v8 = vld [vmem:[%s69_s27] ss:$0 sm:$0xff]  ;;  %206 = vmatpush.msra.mxu2 %v178_v40 }
  0x16   :  { %v75_v9 = vsel %vm74_vm1, %v67_v7, %v261_v8  ;;  %v263_v45 = vld [vmem:[%s472_s8] ss:$0 sm:$0xff] }
  0x17   :  { %250 = vmatmul.msk.f32.vlgmr.msra.gmra.mxu1 %vm108_vm2, %v75_v9 }
  0x92   :  { %v105_v10 = vpop.f32.mrf.mxu0 }
  0x94   :  { %v129_v12 = vpop.f32.mrf.mxu1 }
  0x95   :  { %v130_v13 = vadd.f32 %v129_v12, %v105_v10 }
  0x97   :  { %v136_v14 = vadd.f32 %v262_v11, %v130_v13 }
  0x99   :  { %264 = vtanh.f32 %v136_v14  ;;  %v251_v17 = vmul.f32 -1.442695, %v136_v14 }
  0x9b   :  { %266 = vpow2.f32 %v251_v17 }
  0x9f   :  { %v265_v15 = vpop.eup %264 }
  0xa0   :  { %163 = vrot.lane.b32.xlu0 %v265_v15, %s342_s0 }
  0xa1   :  { %v267_v18 = vpop.eup %266 }
  0xa2   :  { %v140_v19 = vadd.f32 1.0, %v267_v18 }
  0xa4   :  { %268 = vrcp.f32 %v140_v19  ;;  %v152_v25 = vand.u32 2147483648, %v140_v19  ;;  %vm146_vm4 = vweird.f32 %v140_v19  ;;  %v150_v26 = vand.u32 2147483647, %v140_v19 }
  0xa6   :  { %v153_v28 = vor.u32 1.1754944e-38, %v152_v25  ;;  %vm151_vm6 = vcmp.eq.f32.partialorder %v150_v26, 8.507059e+37 }
  0xa8   :  { %158 = vrot.lane.b32.xlu0 %v77_v16, %s343_s29 }
  0xaa   :  { %v269_v20 = vpop.eup %268 }
  0xab   :  { %v142_v21 = vmul.f32 %v269_v20, %v140_v19  ;;  %vm147_vm3 = vweird.f32 %v269_v20 }
  0xac   :  { %vm148_vm5 = vmor %vm146_vm4, %vm147_vm3 }
  0xad   :  { %v143_v22 = vsub.f32 1.0, %v142_v21 }
  0xaf   :  { %v144_v23 = vmul.f32 %v269_v20, %v143_v22 }
  0xb1   :  { %v145_v24 = vadd.f32 %v269_v20, %v144_v23 }
  0xb3   :  { %v149_v27 = vsel %vm148_vm5, %v269_v20, %v145_v24 }
  0xb4   :  { %v154_v30 = vsel %vm151_vm6, %v153_v28, %v149_v27 }
 0x112   :  { %v164_v29 = vpop.permute.xlu0 %163 }
 0x113   :  { %v166_v31 = vmul.f32 %v164_v29, %v154_v30 }
 0x115   :  { %168 = vrot.lane.b32.xlu1 %v166_v31, %s343_s29 }
 0x11a   :  { %v159_v32 = vpop.permute.xlu0 %158 }
 0x11b   :  { %v161_v33 = vmul.f32 %v159_v32, %v154_v30 }
 0x187   :  { %v169_v34 = vpop.permute.xlu1 %168 }
 0x188   :  { %v171_v35 = vadd.f32 %v169_v34, %v161_v33 }
 0x18a   :  { %270 = vtanh.f32 %v171_v35 }
 0x190   :  { %v271_v36 = vpop.eup %270 }
 0x191   :  { %174 = vrot.lane.b32.xlu1 %v271_v36, %s342_s0 }
 0x203   :  { %v175_v41 = vpop.permute.xlu1 %174 }
 0x204   :  { %v177_v42 = vmul.f32 %v175_v41, %v154_v30 }
 0x206   :  { %187 = vrot.lane.b32.xlu2 %v177_v42, %s343_s29 }
 0x20e   :  { %216 = vrot.lane.b32.xlu2 %v171_v35, %s344_s3 }
 0x260   :  { %v188_v43 = vpop.permute.xlu2 %187 }
 0x261   :  { %214 = vst.msk [vmem:[%s474_s10] sm:$0x3] %vm213_vm7, %v188_v43  ;;  %252 = vmatmul.msk.f32.vlgmr.msra.gmra.mxu2 %vm84_vm0, %v188_v43 }
 0x268   :  { %v217_v44 = vpop.permute.xlu2 %216 }
 0x269   :  { %219 = vst.msk [vmem:[%s475_s11] sm:$0x3] %vm213_vm7, %v217_v44 }
 0x2e4   :  { %v208_v46 = vpop.f32.mrf.mxu2 }
 0x2e5   :  { %v209_v47 = vadd.f32 %v263_v45, %v208_v46 }
 0x2e7   :  { %211 = vst [vmem:[#allocation7] sm:$0x3] %v209_v47 }
 0x2e8   :  { %230 = dma.vmem_to_hbm [thread:$0]  %s226_s16, 32, %s228_s19, [#allocation4]  }
 0x2e9   :  { %336 = dma.done.wait [#allocation4], 32  }
 0x2ea   :  { %337 = vsyncadd [#allocation4], 4294967264 }
 0x2eb   :  { %243 = vsyncpa [#allocation3], 1 }
 0x2ec   :  { %244 = vsyncpa [#allocation4], 1 }
 0x2ed   :  { %245 = vsyncpa [#allocation5], 1 }

</bundles_post_ra>
